<compile_context>
chip_gen: v6e
topology: v6e:2x2x1
jax: 0.10.0
libtpu: 0.0.40
codegen_flags: <defaults>
</compile_context>

<pallas_src>
import functools
import math

import jax
import jax.numpy as jnp
from jax import lax
from jax.experimental import pallas as pl
from jax.experimental.pallas import tpu as pltpu


def _round_up(x, m):
    return (x + m - 1) // m * m


def _tpu_vmem_capacity_bytes():
    """Physical VMEM of the local chip (conservative 64 MiB if undeterminable)."""
    try:
        info = pltpu.get_tpu_info()
        cap = getattr(info, "vmem_capacity_bytes", None)
        if cap:
            return int(cap)
    except Exception:
        pass
    return 64 * 1024 * 1024


# --------------------------------------------------------------------------- #
# Small-graph fast path: one full-array block per batch element, no padding.  #
# --------------------------------------------------------------------------- #
def _gcn_small_kernel(*refs, has_bias):
    if has_bias:
        x_ref, adj_ref, w_ref, b_ref, o_ref = refs
    else:
        x_ref, adj_ref, w_ref, o_ref = refs
        b_ref = None
    support = jnp.dot(x_ref[...], w_ref[...], preferred_element_type=jnp.float32)
    out = jnp.dot(adj_ref[...].astype(jnp.float32), support,
                  preferred_element_type=jnp.float32)
    if has_bias:
        out = out + b_ref[...]
    o_ref[...] = out.astype(o_ref.dtype)


def _gcn_small(x, adj, weight, bias2d, out_dtype):
    B, N, Fin = x.shape
    Fout = weight.shape[1]
    has_bias = bias2d is not None

    in_specs = [
        pl.BlockSpec((pl.Squeezed(), N, Fin), lambda b: (b, 0, 0)),
        pl.BlockSpec((pl.Squeezed(), N, N), lambda b: (b, 0, 0)),
        pl.BlockSpec((Fin, Fout), lambda b: (0, 0)),
    ]
    inputs = [x, adj, weight]
    if has_bias:
        in_specs.append(pl.BlockSpec((1, Fout), lambda b: (0, 0)))
        inputs.append(bias2d)

    return pl.pallas_call(
        functools.partial(_gcn_small_kernel, has_bias=has_bias),
        out_shape=jax.ShapeDtypeStruct((B, N, Fout), out_dtype),
        grid_spec=pltpu.PrefetchScalarGridSpec(
            num_scalar_prefetch=0,
            grid=(B,),
            in_specs=in_specs,
            out_specs=pl.BlockSpec((pl.Squeezed(), N, Fout), lambda b: (b, 0, 0)),
        ),
        compiler_params=pltpu.CompilerParams(
            dimension_semantics=("parallel",)),
    )(*inputs)


# --------------------------------------------------------------------------- #
# Tiled path.                                                                 #
# --------------------------------------------------------------------------- #
def _gcn_tiled_kernel(*refs, n_nodes, tk, rag_k, project, has_bias, compute_dtype):
    adj_ref, rhs_ref = refs[0], refs[1]
    idx = 2
    w_ref = b_ref = None
    if project:
        w_ref = refs[idx]
        idx += 1
    if has_bias:
        b_ref = refs[idx]
        idx += 1
    o_ref, acc_ref = refs[idx], refs[idx + 1]

    k = pl.program_id(2)

    @pl.when(k == 0)
    def _():
        acc_ref[...] = jnp.zeros_like(acc_ref)

    # Stream the adjacency tile straight from its original (unpadded, uncast) HBM
    # buffer; the cast to the MXU dtype happens here on the VPU, which rides in
    # otherwise-idle VALU slots while the MXU is busy.
    adj = adj_ref[...].astype(compute_dtype)
    if rag_k:
        # The last k-tile reads past column `n_nodes` of the unpadded adjacency;
        # those values are undefined, so zero them (the rhs rows beyond n_nodes are
        # zero-padded, but 0 * garbage is not a safe identity).
        col = k * tk + lax.broadcasted_iota(jnp.int32, adj.shape, 1)
        adj = jnp.where(col < n_nodes, adj, jnp.zeros_like(adj))

    acc_ref[...] += jnp.dot(adj, rhs_ref[...], preferred_element_type=jnp.float32)

    @pl.when(k == pl.num_programs(2) - 1)
    def _():
        out = acc_ref[...]
        if project:
            # (adj @ x) @ W association: the projection runs once per output tile,
            # so keeping it (and W) in full f32 is essentially free and avoids
            # downcasting the accumulator.
            out = jnp.dot(out, w_ref[...], preferred_element_type=jnp.float32)
        if has_bias:
            out = out + b_ref[...]
        o_ref[...] = out.astype(o_ref.dtype)


def _select_tiles(*, n_nodes, rhs_cols, acc_cols, fout_p, w_resident_bytes,
                  adj_itemsize, rhs_itemsize, out_itemsize, vmem_limit, tk_target):
    """Pick (ti, tk): ti = output-row tile, tk = node-contraction tile.

    tk is made as large as the VMEM budget allows (fewer ~0.35us grid steps, longer
    MXU K, bigger DMA bursts); ti stays moderate since it sets the accumulator /
    output-tile footprint.
    """
    budget = int(vmem_limit * 0.75)             # headroom for Mosaic internals
    ti = min(512, _round_up(n_nodes, 8))
    tk = min(tk_target, _round_up(n_nodes, 128))

    def est(ti_, tk_):
        return (2 * ti_ * tk_ * adj_itemsize         # adj tile (double-buffered)
                + 2 * tk_ * rhs_cols * rhs_itemsize  # rhs tile (double-buffered)
                + 2 * ti_ * fout_p * out_itemsize    # output tile (double-buffered)
                + ti_ * acc_cols * 4                 # f32 accumulator scratch
                + 2 * w_resident_bytes)              # resident f32 W (if any)

    while est(ti, tk) > budget and tk > 128:
        tk = max(128, (tk // 2) // 128 * 128)
    while est(ti, tk) > budget and ti > 8:
        ti = max(8, (ti // 2) // 8 * 8)
    return ti, tk


def _gcn_tiled(x, adj, weight, bias2d, out_dtype, compute_dtype):
    B, N, Fin = x.shape
    Fout = weight.shape[1]
    has_bias = bias2d is not None

    if compute_dtype is None:
        # bf16 MXU inputs by default: native MXU rate on every generation and half
        # the VMEM/HBM per streamed tile; accumulation and the W epilogue stay f32.
        compute_dtype = jnp.bfloat16 if x.dtype == jnp.float32 else x.dtype
    compute_dtype = jnp.dtype(compute_dtype)

    Fin_p = _round_up(Fin, 128)
    Fout_p = _round_up(Fout, 128)

    # Association, chosen at trace time:
    #   project=True  : acc = adj @ x (streamed)  ; out = acc @ W   (Fin < Fout)
    #   project=False : rhs = x @ W (computed ONCE); out = adj @ rhs (Fout <= Fin)
    # The resident f32 W is capped at 8 MiB so its double-buffered footprint fits
    # v7x's 64 MiB VMEM; beyond that we use the precomputed-support path instead.
    # (A further refinement for huge Fin*Fout would be an extra Fout-tiling axis.)
    project = (Fin < Fout) and (Fin_p * Fout_p * 4 <= 8 * 1024 * 1024)

    if project:
        rhs_cols = Fin_p
        rhs_src = x
        w_p = jnp.pad(weight.astype(jnp.float32),
                      ((0, Fin_p - Fin), (0, Fout_p - Fout)))
        w_resident_bytes = Fin_p * Fout_p * 4
    else:
        rhs_cols = Fout_p
        # support = x @ W computed ONCE outside the k-loop (plain XLA matmul is
        # fine: it is the O(B*N*Fin*Fout) term, dwarfed by the O(B*N^2) term), so
        # the kernel never recomputes x_tile @ W per (b, i, k) step.
        prec = (lax.Precision.HIGHEST if compute_dtype == jnp.float32
                else lax.Precision.DEFAULT)
        rhs_src = jnp.matmul(x, weight, preferred_element_type=jnp.float32,
                             precision=prec)
        w_p = None
        w_resident_bytes = 0
    acc_cols = rhs_cols

    # Per-generation VMEM budget / contraction-tile target.
    vmem_cap = _tpu_vmem_capacity_bytes()
    if vmem_cap >= 100 * 1024 * 1024:         # v5e / v6e: 128 MiB physical VMEM
        vmem_limit = 100 * 1024 * 1024
        tk_target = 4096
    else:                                      # v7x: 64 MiB physical VMEM
        vmem_limit = 48 * 1024 * 1024
        tk_target = 2048

    ti, tk = _select_tiles(
        n_nodes=N, rhs_cols=rhs_cols, acc_cols=acc_cols, fout_p=Fout_p,
        w_resident_bytes=w_resident_bytes,
        adj_itemsize=jnp.dtype(adj.dtype).itemsize,
        rhs_itemsize=compute_dtype.itemsize,
        out_itemsize=jnp.dtype(out_dtype).itemsize,
        vmem_limit=vmem_limit, tk_target=tk_target)

    N_i_pad = _round_up(N, ti)   # output rows (garbage tail rows sliced off below)
    N_k_pad = _round_up(N, tk)   # contraction extent (rhs zero-padded, adj masked)
    rag_k = (N % tk) != 0

    # Only the small operand (x or support, O(B*N*F)) is padded/cast in the
    # wrapper; the O(B*N^2) adjacency is NOT copied.
    rhs_p = jnp.pad(
        rhs_src, ((0, 0), (0, N_k_pad - N), (0, rhs_cols - rhs_src.shape[-1]))
    ).astype(compute_dtype)

    in_specs = [
        pl.BlockSpec((pl.Squeezed(), ti, tk), lambda b, i, k: (b, i, k)),      # adj
        pl.BlockSpec((pl.Squeezed(), tk, rhs_cols), lambda b, i, k: (b, k, 0)),
    ]
    inputs = [adj, rhs_p]
    if project:
        in_specs.append(pl.BlockSpec((Fin_p, Fout_p), lambda b, i, k: (0, 0)))
        inputs.append(w_p)
    if has_bias:
        bias_p = jnp.pad(bias2d, ((0, 0), (0, Fout_p - Fout)))
        in_specs.append(pl.BlockSpec((1, Fout_p), lambda b, i, k: (0, 0)))
        inputs.append(bias_p)

    grid = (B, N_i_pad // ti, N_k_pad // tk)

    # Advisory cost estimate for XLA scheduling.
    if project:
        flops = 2 * B * N_i_pad * N_k_pad * Fin_p + 2 * B * N_i_pad * Fin_p * Fout_p
    else:
        flops = 2 * B * N_i_pad * N_k_pad * Fout_p
    bytes_accessed = (adj.size * jnp.dtype(adj.dtype).itemsize
                      + (N_i_pad // ti) * rhs_p.size * rhs_p.dtype.itemsize
                      + (w_p.size * 4 if project else 0)
                      + B * N_i_pad * Fout_p * jnp.dtype(out_dtype).itemsize)

    kernel = functools.partial(
        _gcn_tiled_kernel, n_nodes=N, tk=tk, rag_k=rag_k,
        project=project, has_bias=has_bias, compute_dtype=compute_dtype)

    out_p = pl.pallas_call(
        kernel,
        out_shape=jax.ShapeDtypeStruct((B, N_i_pad, Fout_p), out_dtype),
        grid_spec=pltpu.PrefetchScalarGridSpec(
            num_scalar_prefetch=0,
            grid=grid,
            in_specs=in_specs,
            out_specs=pl.BlockSpec((pl.Squeezed(), ti, Fout_p),
                                   lambda b, i, k: (b, i, 0)),
            scratch_shapes=[pltpu.VMEM((ti, acc_cols), jnp.float32)],
        ),
        compiler_params=pltpu.CompilerParams(
            dimension_semantics=("parallel", "parallel", "arbitrary"),
            vmem_limit_bytes=vmem_limit,
        ),
        cost_estimate=pl.CostEstimate(
            flops=int(flops), transcendentals=0,
            bytes_accessed=int(bytes_accessed)),
    )(*inputs)

    return out_p[:, :N, :Fout]


# --------------------------------------------------------------------------- #
# Public entry point (matches GraphConvolution.forward).                      #
# --------------------------------------------------------------------------- #
def graph_convolution(x, adj, weight, bias=None, *, compute_dtype=None):
    """GCN forward: output = adj @ (x @ weight) (+ bias).

    x: [B, N, Fin], adj: [B, N, N], weight: [Fin, Fout],
    bias: broadcastable to [Fout] (e.g. torch's (1, 1, Fout)) or None.
    compute_dtype: MXU input dtype for the tiled path (default: bf16 for f32
    inputs, with f32 accumulation and f32 W/epilogue); pass jnp.float32 for
    strict f32 numerics. The small-graph path always uses exact f32 math.
    """
    B, N, Fin = x.shape
    Fout = weight.shape[1]
    assert adj.shape == (B, N, N), (adj.shape, x.shape)
    assert weight.shape == (Fin, Fout)

    out_dtype = x.dtype
    bias2d = None
    if bias is not None:
        bias2d = jnp.reshape(jnp.asarray(bias), (1, Fout)).astype(jnp.float32)

    # Small-graph fast path: a single full-array block per batch element (no node /
    # feature padding, no tiling machinery) -- the tiled kernel would spend >95% of
    # its MXU work and HBM traffic on zero padding for graphs this small.
    if N <= 256 and Fin <= 1024 and Fout <= 1024:
        try:
            return _gcn_small(x, adj, weight, bias2d, out_dtype)
        except Exception:
            # If the unaligned single-block dots are rejected by the compiler on a
            # given toolchain, fall back to the strict-f32 tiled path.
            return _gcn_tiled(x, adj, weight, bias2d, out_dtype, jnp.float32)

    return _gcn_tiled(x, adj, weight, bias2d, out_dtype, compute_dtype)


if __name__ == "__main__":
    key = jax.random.PRNGKey(0)
    keys = jax.random.split(key, 9)

    def make_case(kx, ka, kw, B, N, Fin, Fout):
        x = jax.random.normal(kx, (B, N, Fin), dtype=jnp.float32)
        adj = jax.random.uniform(ka, (B, N, N), dtype=jnp.float32)
        adj = adj / jnp.sum(adj, axis=-1, keepdims=True)   # row-normalized adjacency
        std = math.sqrt(2.0 / (Fin + Fout))                 # xavier_normal_
        w = std * jax.random.normal(kw, (Fin, Fout), dtype=jnp.float32)
        ref = jnp.matmul(adj, jnp.matmul(x, w, precision=lax.Precision.HIGHEST),
                         precision=lax.Precision.HIGHEST)
        return x, adj, w, ref

    # 1) Small-graph fast path (single block per batch, exact f32 math).
    x, adj, w, ref = make_case(keys[0], keys[1], keys[2], 2, 8, 16, 32)
    out = jax.block_until_ready(graph_convolution(x, adj, w))
    assert out.shape == (2, 8, 32)
    assert jnp.allclose(out, ref, atol=1e-5, rtol=1e-5)

    bias = jnp.full((1, 1, 32), 0.1, dtype=jnp.float32)     # torch init: constant 0.1
    out_b = jax.block_until_ready(graph_convolution(x, adj, w, bias=bias))
    assert jnp.allclose(out_b, ref + 0.1, atol=1e-5, rtol=1e-5)

    # 2) Tiled path, reassociated ((adj@x)@W since Fin<Fout), ragged node tiles.
    x2, adj2, w2, ref2 = make_case(keys[3], keys[4], keys[5], 2, 300, 64, 160)
    out2 = jax.block_until_ready(graph_convolution(x2, adj2, w2))   # bf16 MXU default
    assert out2.shape == (2, 300, 160)
    assert jnp.allclose(out2, ref2, atol=2e-2, rtol=5e-2)
    out2_f32 = jax.block_until_ready(
        graph_convolution(x2, adj2, w2, compute_dtype=jnp.float32))  # strict numerics
    assert jnp.allclose(out2_f32, ref2, atol=1e-3, rtol=1e-3)

    # 3) Tiled path, precomputed-support (adj@(x@W) since Fout<=Fin).
    x3, adj3, w3, ref3 = make_case(keys[6], keys[7], keys[8], 2, 300, 160, 64)
    out3 = jax.block_until_ready(graph_convolution(x3, adj3, w3))
    assert out3.shape == (2, 300, 64)
    assert jnp.allclose(out3, ref3, atol=2e-2, rtol=5e-2)

    print("KERNEL_OK")
</pallas_src>

<mosaic_0001>
module attributes {stable_mosaic.version = 11 : i64} {
  func.func @_gcn_small_kernel(%arg0: i32, %arg1: memref<1x8x16xf32, #tpu.memory_space<vmem>>, %arg2: memref<1x8x8xf32, #tpu.memory_space<vmem>>, %arg3: memref<16x32xf32, #tpu.memory_space<vmem>>, %arg4: memref<1x8x32xf32, #tpu.memory_space<vmem>>) attributes {dimension_semantics = [#tpu.dimension_semantics<parallel>], iteration_bounds = array<i64: 2>, scalar_prefetch = 0 : i64, scratch_operands = 0 : i64, tpu.core_type = #tpu.core_type<tc>, window_params = [{transform_indices = @transform_0, window_bounds = array<i64: 1, 8, 16>}, {transform_indices = @transform_1, window_bounds = array<i64: 1, 8, 8>}, {pipeline_mode = #tpu.pipeline_mode<synchronous>, transform_indices = @transform_2, window_bounds = array<i64: 16, 32>}, {transform_indices = @transform_3, window_bounds = array<i64: 1, 8, 32>}]} {
    %c0 = arith.constant 0 : index
    %c0_0 = arith.constant 0 : index
    %c0_1 = arith.constant 0 : index
    %0 = vector.load %arg1[%c0, %c0_0, %c0_1] : memref<1x8x16xf32, #tpu.memory_space<vmem>>, vector<1x8x16xf32>
    %1 = vector.shape_cast %0 : vector<1x8x16xf32> to vector<8x16xf32>
    %c0_2 = arith.constant 0 : index
    %c0_3 = arith.constant 0 : index
    %2 = vector.load %arg3[%c0_2, %c0_3] : memref<16x32xf32, #tpu.memory_space<vmem>>, vector<16x32xf32>
    %cst = arith.constant dense<0.000000e+00> : vector<8x32xf32>
    %3 = tpu.matmul %1, %2, %cst {dimension_numbers = #tpu.dot_dimension_numbers<[1], [0], [0], [1], [0, 0, 1, 1], [], []>} : vector<8x16xf32>, vector<16x32xf32>, vector<8x32xf32> -> vector<8x32xf32>
    %c0_4 = arith.constant 0 : index
    %c0_5 = arith.constant 0 : index
    %c0_6 = arith.constant 0 : index
    %4 = vector.load %arg2[%c0_4, %c0_5, %c0_6] : memref<1x8x8xf32, #tpu.memory_space<vmem>>, vector<1x8x8xf32>
    %5 = vector.shape_cast %4 : vector<1x8x8xf32> to vector<8x8xf32>
    %cst_7 = arith.constant dense<0.000000e+00> : vector<8x32xf32>
    %6 = tpu.matmul %5, %3, %cst_7 {dimension_numbers = #tpu.dot_dimension_numbers<[1], [0], [0], [1], [0, 0, 1, 1], [], []>} : vector<8x8xf32>, vector<8x32xf32>, vector<8x32xf32> -> vector<8x32xf32>
    %c0_8 = arith.constant 0 : index
    %c0_9 = arith.constant 0 : index
    %c0_10 = arith.constant 0 : index
    %7 = vector.load %arg4[%c0_8, %c0_9, %c0_10] : memref<1x8x32xf32, #tpu.memory_space<vmem>>, vector<1x8x32xf32>
    %8 = vector.shape_cast %7 : vector<1x8x32xf32> to vector<8x32xf32>
    %9 = vector.shape_cast %6 : vector<8x32xf32> to vector<1x8x32xf32>
    tpu.vector_store %arg4[%c0_8, %c0_9, %c0_10], %9 {strides = array<i32>} : memref<1x8x32xf32, #tpu.memory_space<vmem>>, vector<1x8x32xf32>,
    return
  }
  func.func @transform_0(%arg0: i32) -> (i32, i32, i32) {
    %c0_i32 = arith.constant 0 : i32
    %c0_i32_0 = arith.constant 0 : i32
    %c0_i32_1 = arith.constant 0 : i32
    return %arg0, %c0_i32, %c0_i32_0 : i32, i32, i32
  }
  func.func @transform_1(%arg0: i32) -> (i32, i32, i32) {
    %c0_i32 = arith.constant 0 : i32
    %c0_i32_0 = arith.constant 0 : i32
    %c0_i32_1 = arith.constant 0 : i32
    return %arg0, %c0_i32, %c0_i32_0 : i32, i32, i32
  }
  func.func @transform_2(%arg0: i32) -> (i32, i32) {
    %c0_i32 = arith.constant 0 : i32
    %c0_i32_0 = arith.constant 0 : i32
    %c0_i32_1 = arith.constant 0 : i32
    return %c0_i32, %c0_i32_0 : i32, i32
  }
  func.func @transform_3(%arg0: i32) -> (i32, i32, i32) {
    %c0_i32 = arith.constant 0 : i32
    %c0_i32_0 = arith.constant 0 : i32
    %c0_i32_1 = arith.constant 0 : i32
    return %arg0, %c0_i32, %c0_i32_0 : i32, i32, i32
  }
}

module attributes {stable_mosaic.version = 11 : i64} {
  func.func @_gcn_tiled_kernel(%arg0: i32, %arg1: i32, %arg2: i32, %arg3: memref<1x8x128xf32, #tpu.memory_space<vmem>>, %arg4: memref<1x128x128xf32, #tpu.memory_space<vmem>>, %arg5: memref<128x128xf32, #tpu.memory_space<vmem>>, %arg6: memref<1x8x128xf32, #tpu.memory_space<vmem>>, %arg7: memref<8x128xf32, #tpu.memory_space<vmem>>) attributes {dimension_semantics = [#tpu.dimension_semantics<parallel>, #tpu.dimension_semantics<parallel>, #tpu.dimension_semantics<arbitrary>], iteration_bounds = array<i64: 2, 1, 1>, scalar_prefetch = 0 : i64, scratch_operands = 1 : i64, tpu.core_type = #tpu.core_type<tc>, window_params = [{transform_indices = @transform_0, window_bounds = array<i64: 1, 8, 128>}, {transform_indices = @transform_1, window_bounds = array<i64: 1, 128, 128>}, {pipeline_mode = #tpu.pipeline_mode<synchronous>, transform_indices = @transform_2, window_bounds = array<i64: 128, 128>}, {transform_indices = @transform_3, window_bounds = array<i64: 1, 8, 128>}]} {
    %c0_i32 = arith.constant 0 : i32
    %0 = arith.cmpi eq, %arg2, %c0_i32 : i32
    %1 = arith.extui %0 : i1 to i32
    %c0_i32_0 = arith.constant 0 : i32
    %2 = arith.cmpi ne, %1, %c0_i32_0 : i32
    scf.if %2 {
      %cst_13 = arith.constant 0.000000e+00 : f32
      %22 = vector.broadcast %cst_13 : f32 to vector<8x128xf32>
      %c0_14 = arith.constant 0 : index
      %c0_15 = arith.constant 0 : index
      %23 = vector.load %arg7[%c0_14, %c0_15] : memref<8x128xf32, #tpu.memory_space<vmem>>, vector<8x128xf32>
      tpu.vector_store %arg7[%c0_14, %c0_15], %22 {strides = array<i32>} : memref<8x128xf32, #tpu.memory_space<vmem>>, vector<8x128xf32>,
    } else {
    }
    %c0 = arith.constant 0 : index
    %c0_1 = arith.constant 0 : index
    %c0_2 = arith.constant 0 : index
    %3 = vector.load %arg3[%c0, %c0_1, %c0_2] : memref<1x8x128xf32, #tpu.memory_space<vmem>>, vector<1x8x128xf32>
    %4 = vector.shape_cast %3 : vector<1x8x128xf32> to vector<8x128xf32>
    %c128_i32 = arith.constant 128 : i32
    %5 = arith.muli %arg2, %c128_i32 : i32
    %6 = tpu.iota {dimensions = array<i32: 1>} : vector<8x128xi32>
    %7 = vector.broadcast %5 : i32 to vector<8x128xi32>
    %8 = arith.addi %7, %6 : vector<8x128xi32>
    %c8_i32 = arith.constant 8 : i32
    %9 = vector.broadcast %c8_i32 : i32 to vector<8x128xi32>
    %10 = arith.cmpi slt, %8, %9 : vector<8x128xi32>
    %cst = arith.constant 0.000000e+00 : f32
    %11 = vector.broadcast %cst : f32 to vector<8x128xf32>
    %12 = arith.select %10, %4, %11 : vector<8x128xi1>, vector<8x128xf32>
    %c0_3 = arith.constant 0 : index
    %c0_4 = arith.constant 0 : index
    %13 = vector.load %arg7[%c0_3, %c0_4] : memref<8x128xf32, #tpu.memory_space<vmem>>, vector<8x128xf32>
    %c0_5 = arith.constant 0 : index
    %c0_6 = arith.constant 0 : index
    %c0_7 = arith.constant 0 : index
    %14 = vector.load %arg4[%c0_5, %c0_6, %c0_7] : memref<1x128x128xf32, #tpu.memory_space<vmem>>, vector<1x128x128xf32>
    %15 = vector.shape_cast %14 : vector<1x128x128xf32> to vector<128x128xf32>
    %cst_8 = arith.constant dense<0.000000e+00> : vector<8x128xf32>
    %16 = tpu.matmul %12, %15, %cst_8 {dimension_numbers = #tpu.dot_dimension_numbers<[1], [0], [0], [1], [0, 0, 1, 1], [], []>} : vector<8x128xf32>, vector<128x128xf32>, vector<8x128xf32> -> vector<8x128xf32>
    %17 = arith.addf %13, %16 : vector<8x128xf32>
    %c0_9 = arith.constant 0 : index
    %c0_10 = arith.constant 0 : index
    %18 = vector.load %arg7[%c0_9, %c0_10] : memref<8x128xf32, #tpu.memory_space<vmem>>, vector<8x128xf32>
    tpu.vector_store %arg7[%c0_9, %c0_10], %17 {strides = array<i32>} : memref<8x128xf32, #tpu.memory_space<vmem>>, vector<8x128xf32>,
    %c0_i32_11 = arith.constant 0 : i32
    %19 = arith.cmpi eq, %arg2, %c0_i32_11 : i32
    %20 = arith.extui %19 : i1 to i32
    %c0_i32_12 = arith.constant 0 : i32
    %21 = arith.cmpi ne, %20, %c0_i32_12 : i32
    scf.if %21 {
      %c0_13 = arith.constant 0 : index
      %c0_14 = arith.constant 0 : index
      %22 = vector.load %arg7[%c0_13, %c0_14] : memref<8x128xf32, #tpu.memory_space<vmem>>, vector<8x128xf32>
      %c0_15 = arith.constant 0 : index
      %c0_16 = arith.constant 0 : index
      %23 = vector.load %arg5[%c0_15, %c0_16] : memref<128x128xf32, #tpu.memory_space<vmem>>, vector<128x128xf32>
      %cst_17 = arith.constant dense<0.000000e+00> : vector<8x128xf32>
      %24 = tpu.matmul %22, %23, %cst_17 {dimension_numbers = #tpu.dot_dimension_numbers<[1], [0], [0], [1], [0, 0, 1, 1], [], []>} : vector<8x128xf32>, vector<128x128xf32>, vector<8x128xf32> -> vector<8x128xf32>
      %c0_18 = arith.constant 0 : index
      %c0_19 = arith.constant 0 : index
      %c0_20 = arith.constant 0 : index
      %25 = vector.load %arg6[%c0_18, %c0_19, %c0_20] : memref<1x8x128xf32, #tpu.memory_space<vmem>>, vector<1x8x128xf32>
      %26 = vector.shape_cast %25 : vector<1x8x128xf32> to vector<8x128xf32>
      %27 = vector.shape_cast %24 : vector<8x128xf32> to vector<1x8x128xf32>
      tpu.vector_store %arg6[%c0_18, %c0_19, %c0_20], %27 {strides = array<i32>} : memref<1x8x128xf32, #tpu.memory_space<vmem>>, vector<1x8x128xf32>,
    } else {
    }
    return
  }
  func.func @transform_0(%arg0: i32, %arg1: i32, %arg2: i32) -> (i32, i32, i32) {
    %c0_i32 = arith.constant 0 : i32
    return %arg0, %arg1, %arg2 : i32, i32, i32
  }
  func.func @transform_1(%arg0: i32, %arg1: i32, %arg2: i32) -> (i32, i32, i32) {
    %c0_i32 = arith.constant 0 : i32
    %c0_i32_0 = arith.constant 0 : i32
    return %arg0, %arg2, %c0_i32 : i32, i32, i32
  }
  func.func @transform_2(%arg0: i32, %arg1: i32, %arg2: i32) -> (i32, i32) {
    %c0_i32 = arith.constant 0 : i32
    %c0_i32_0 = arith.constant 0 : i32
    %c0_i32_1 = arith.constant 0 : i32
    return %c0_i32, %c0_i32_0 : i32, i32
  }
  func.func @transform_3(%arg0: i32, %arg1: i32, %arg2: i32) -> (i32, i32, i32) {
    %c0_i32 = arith.constant 0 : i32
    %c0_i32_0 = arith.constant 0 : i32
    return %arg0, %arg1, %c0_i32 : i32, i32, i32
  }
}

</mosaic_0001>

<bundles_post_ra>
// kernel: tpu_custom_call.1
= control target key start
LH: loop header
LB: loop body
LE: loop exit
PB: predicated region body
PF: predicated region fallthrough
CT: control target
= control target key end

     0   :  { %8 = vsyncpa [#allocation3], 0  ;;  %s1003_s0 = inlined_call_operand.hbm [shape: f32[2,8,16], index: 0, kind: input, shape index: {}]   ;;  %s1004_s1 = inlined_call_operand.hbm [shape: f32[2,8,8], index: 1, kind: input, shape index: {}]   ;;  %s1005_s2 = inlined_call_operand.hbm [shape: f32[16,32], index: 2, kind: input, shape index: {}]   ;;  %s1006_s3 = inlined_call_operand.hbm [shape: f32[2,8,32], index: 3, kind: output, shape index: {}]  }
   0x1   :  { %10 = vsyncpa [#allocation3 + $0x1], 0 }
   0x2   :  { %11 = vsyncpa [#allocation6], 0 }
   0x3   :  { %13 = vsyncpa [#allocation6 + $0x1], 0 }
   0x4   :  { %14 = vsyncpa [#allocation4], 0 }
   0x5   :  { %16 = vsyncpa [#allocation4 + $0x1], 0  ;;  %s793_s12 = smov 0   ;;  %s795_s13 = smov 0  }
   0x6   :  { %s797_s14 = smov 0   ;;  %s799_s15 = smov 0  }
   0x7 LB: > { %s814_s16 = sadd.s32 4294967295, %s763_s15   ;;  %s507_s17 = sadd.s32 4294967294, %s763_s15   ;;  %s763_s15 = sphi %s799_s15, %s1028_s15   ;;  %s759_s14 = sphi %s797_s14, %s1027_s14   ;;  %s755_s13 = sphi %s795_s13, %s1026_s13   ;;  %s751_s12 = sphi %s793_s12, %s1025_s12  }
   0x8   : > { %p42_p0 = scmp.ne.s32.totalorder %s755_s13, %s751_s12  ;;  %p1007_p1 = scmp.eq.s32.totalorder %s814_s16, 0 }
   0x9   : > { %p119_p3 = scmp.eq.s32.totalorder %s507_s17, 1  ;;  %p508_p5 = scmp.ge.s32.totalorder %s763_s15, 1 }
   0xa   : > { %p823_p4 = por %p1007_p1, %p42_p0  ;;  %p126_p7 = scmp.lt.s32.totalorder %s763_s15, 3 }
   0xb   : > { %p828_p6 = por %p119_p3, %p42_p0  ;;  %s765_s21 = smov [#allocation7]  }
   0xc   : > { %s1011_s18 = scalar_select %p823_p4, 1, 0 }
   0xd   : > { %s1012_s19 = scalar_select %p828_p6, 1, 0 }
   0xe   : > { %p833_p8 = pnand %p508_p5, %p126_p7  ;;  %s138_s22 = sshll.u32 %s765_s21, 4  ;;  %s139_s22 = int_to_ptr.vmem [resolvable:$true] %s138_s22 }
   0xf   : > { %s847_s24 = sadd.s32 1, %s763_s15   ;;  %s29_s25 = sadd.s32 1, %s759_s14 }
  0x10   : > { %s1013_s20 = scalar_select %p833_p8, 1, 0 }
  0x11   : > { %p553_p9 = pneg %p833_p8  ;;  %s26_s26 = ssub.s32 %s763_s15, %s847_s24 }
  0x12   : > { %s620_s27 = scalar_lea.vmem %s139_s22, 256  ;;  %p628_p5 = scmp.lt.s32.totalorder %s139_s22, %s139_s22 }
  0x13   : > { %p842_p11 = pnand %p553_p9, %p1007_p1  ;;  %p621_p13 = scmp.ne.s32.totalorder %s139_s22, %s620_s27 }
  0x14   : > { %p629_p7 = scmp.lt.s32.totalorder %s620_s27, %s620_s27 }
  0x15   : > { %p611_p12 = pneg %p842_p11 }
  0x16   : > { %p630_p10 = por %p629_p7, %p628_p5 }
  0x17   : > { %p623_p0 = pnand %p621_p13, %p611_p12 }
  0x19   : > { %p624_p3 = pneg %p623_p0 }
  0x1b   : > { %p631_p2 = pnand %p630_p10, %p624_p3 }
  0x1d   : > { %634 = shalt.err (!%p631_p2)
}
  0x1e   : > { %s766_s28 = smov 128   ;;  %s767_s29 = smov 8  }
  0x1f   : > { %556 = dma.hbm_to_vmem [thread:$0]  (!%p842_p11), %s1005_s2, 256, %s139_s22, [#allocation6], %s766_s28, %s766_s28, %s767_s29  }
  0x20   : > { %p27_p9 = scmp.eq.s32.totalorder %s26_s26, 0  ;;  %p36_p12 = scmp.ne.s32.totalorder %s759_s14, %s755_s13 }
  0x21   : > { %p37_p10 = scmp.eq.s32.totalorder %s763_s15, 0  ;;  %p569_p2 = scmp.lt.s32.totalorder %s763_s15, 2 }
  0x22   : > { %s864_s5 = scalar_select %p27_p9, %s759_s14, %s29_s25  }
  0x23   : > { %p38_p13 = por %p37_p10, %p36_p12  ;;  %p1015_p0 = scmp.eq.s32.totalorder %s814_s16, 1 }
  0x24   : > { %s152_s7 = sand.u32 1, %s759_s14   ;;  %s512_s8 = sshll.u32 %s763_s15, 7 }
  0x25   : > { %p868_p3 = por %p1015_p0, %p36_p12  ;;  %s874_s9 = sshll.u32 %s152_s7, 3 }
  0x26   : > { %s879_s17 = scalar_lea.hbm %s1003_s0, %s512_s8  ;;  %s156_s21 = scalar_lea.vmem [#allocation2], %s874_s9 }
  0x27   : > { %s1016_s6 = scalar_select %p868_p3, 1, 0 }
  0x28   : > { %s163_s22 = sshll.u32 %s156_s21, 4  ;;  %p882_p11 = pnand %p569_p2, %p38_p13  ;;  %s164_s22 = int_to_ptr.vmem [resolvable:$true] %s163_s22 }
  0x29   : > { %s889_s27 = scalar_lea.hbm %s1004_s1, %s512_s8  ;;  %s153_s28 = scalar_lea.sflag [#allocation3], %s152_s7 }
  0x2a   : > { %s635_s29 = scalar_lea.hbm %s879_s17, 128  ;;  %p637_p7 = pneg %p882_p11 }
  0x2b   : > { %p636_p5 = scmp.ne.s32.totalorder %s879_s17, %s635_s29  ;;  %s640_s10 = scalar_lea.hbm %s1003_s0, 256 }
  0x2c   : > { %p641_p10 = scmp.lt.s32.totalorder %s879_s17, %s1003_s0  ;;  %p642_p2 = scmp.lt.s32.totalorder %s640_s10, %s635_s29 }
  0x2d   : > { %p638_p9 = pnand %p637_p7, %p636_p5 }
  0x2e   : > { %p643_p13 = por %p642_p2, %p641_p10 }
  0x2f   : > { %p639_p12 = pneg %p638_p9 }
  0x31   : > { %p644_p0 = pnand %p643_p13, %p639_p12 }
  0x33   : > { %647 = shalt.err (!%p644_p0)
}
  0x34   : > { %s648_s7 = scalar_lea.vmem %s164_s22, 128  ;;  %s768_s8 = smov [#allocation2]  }
  0x35   : > { %p649_p1 = scmp.ne.s32.totalorder %s164_s22, %s648_s7  ;;  %s653_s25 = sshll.u32 %s768_s8, 4  ;;  %s654_s25 = int_to_ptr.vmem [resolvable:$false] %s653_s25 }
  0x36   : > { %s655_s26 = scalar_lea.vmem %s654_s25, 256  ;;  %p656_p9 = scmp.lt.s32.totalorder %s164_s22, %s654_s25 }
  0x37   : > { %p651_p6 = pnand %p649_p1, %p637_p7  ;;  %p657_p3 = scmp.lt.s32.totalorder %s655_s26, %s648_s7 }
  0x39   : > { %p652_p5 = pneg %p651_p6  ;;  %p658_p4 = por %p657_p3, %p656_p9 }
  0x3b   : > { %p659_p8 = pnand %p658_p4, %p652_p5 }
  0x3d   : > { %662 = shalt.err (!%p659_p8)
}
  0x3e   : > { %560 = dma.hbm_to_vmem [thread:$0]  (!%p882_p11), %s879_s17, 128, %s164_s22, %s153_s28  }
  0x3f   : > { %s170_s29 = sand.u32 1, %s763_s15   ;;  %s174_s30 = scalar_lea.vmem [#allocation5], %s874_s9 }
  0x40   : > { %s181_s4 = sshll.u32 %s174_s30, 4  ;;  %s171_s10 = scalar_lea.sflag [#allocation6], %s170_s29  ;;  %s182_s4 = int_to_ptr.vmem [resolvable:$true] %s181_s4 }
  0x41   : > { %s663_s11 = scalar_lea.hbm %s889_s27, 128  ;;  %s668_s8 = scalar_lea.hbm %s1004_s1, 256 }
  0x42   : > { %p664_p1 = scmp.ne.s32.totalorder %s889_s27, %s663_s11  ;;  %p669_p8 = scmp.lt.s32.totalorder %s889_s27, %s1004_s1 }
  0x43   : > { %p670_p3 = scmp.lt.s32.totalorder %s668_s8, %s663_s11 }
  0x44   : > { %p666_p4 = pnand %p664_p1, %p637_p7 }
  0x45   : > { %p671_p12 = por %p670_p3, %p669_p8 }
  0x46   : > { %p667_p6 = pneg %p666_p4 }
  0x48   : > { %p672_p10 = pnand %p671_p12, %p667_p6 }
  0x4a   : > { %675 = shalt.err (!%p672_p10)
}
  0x4b   : > { %s676_s9 = scalar_lea.vmem %s182_s4, 128  ;;  %s769_s17 = smov [#allocation5]  }
  0x4c   : > { %p677_p2 = scmp.ne.s32.totalorder %s182_s4, %s676_s9  ;;  %s681_s22 = sshll.u32 %s769_s17, 4  ;;  %s682_s22 = int_to_ptr.vmem [resolvable:$false] %s681_s22 }
  0x4d   : > { %s683_s28 = scalar_lea.vmem %s682_s22, 256  ;;  %p684_p5 = scmp.lt.s32.totalorder %s182_s4, %s682_s22 }
  0x4e   : > { %p679_p13 = pnand %p677_p2, %p637_p7  ;;  %p685_p9 = scmp.lt.s32.totalorder %s683_s28, %s676_s9 }
  0x50   : > { %p680_p0 = pneg %p679_p13  ;;  %p686_p1 = por %p685_p9, %p684_p5 }
  0x52   : > { %p687_p4 = pnand %p686_p1, %p680_p0 }
  0x54   : > { %690 = shalt.err (!%p687_p4)
}
  0x55   : > { %563 = dma.hbm_to_vmem [thread:$0]  (!%p882_p11), %s889_s27, 128, %s182_s4, %s171_s10  }
  0x56   : > { %p1018_p6 = scmp.ne.s32.totalorder %s1013_s20, 0 }
  0x57   : > { %s934_s29 = sand.u32 (!%p1018_p6), 1, %s755_s13   ;;  %p1019_p7 = scmp.ne.s32.totalorder (!%p1018_p6), %s1011_s18, 0 }
  0x58   : > { %190 = sbr.rel (%p1018_p6) target bundleno = 507 (0x1fb), region = 32  ;;  %s937_s30 = sshll.u32 (!%p1018_p6), %s934_s29, 3 }
  0x59   : > { %s193_s11 = scalar_lea.sflag (!%p1018_p6), [#allocation3], %s934_s29  ;;  %s196_s21 = scalar_lea.vmem (!%p1018_p6), [#allocation2], %s937_s30 }
  0x5d   : > { %734 = dma.done.wait (%p1019_p7), %s193_s11, 128  }
  0x5e   : > { %736 = vsyncadd (%p1019_p7), %s193_s11, 4294967168  ;;  %s201_s20 = sand.u32 1, %s814_s16   ;;  %s205_s27 = scalar_lea.vmem [#allocation5], %s937_s30 }
  0x5f   : > { %s202_s23 = scalar_lea.sflag [#allocation6], %s201_s20 }
  0x60   : > { %738 = dma.done.wait (%p1019_p7), %s202_s23, 128  }
  0x61   : > { %740 = vsyncadd (%p1019_p7), %s202_s23, 4294967168  ;;  %p1020_p11 = scmp.eq.s32.totalorder %s814_s16, 0 }
  0x63   : > { %742 = dma.done.wait (%p1020_p11), [#allocation6], 256   ;;  %p1021_p8 = pmov %p1020_p11 }
  0x64   : > { %v770_v0 = vmov 0.0   ;;  %vm771_vm0 = vmmov 0   ;;  %v239_v1 = vld [vmem:[#allocation7 + $0x8] sm:$0xff]  ;;  %v238_v2 = vld [vmem:[#allocation7] sm:$0xff]  ;;  %vm240_vm1 = vcmask 130048   ;;  %v314_v4 = vld [vmem:[%s205_s27] sm:$0xff] }
  0x65   : > { %744 = vsyncadd (%p1021_p8), [#allocation6], 4294967040  ;;  %531 = vmatprep.subr.mxu0 %v770_v0  ;;  %535 = vmatprep.mubr.msk.f32.mxu0 %vm771_vm0, %v770_v0  ;;  %v237_v3 = vld [vmem:[%s196_s21] sm:$0xff]  ;;  %vm315_vm2 = vcmask 64512   ;;  %s523_s18 = sshll.u32 %s814_s16, 7  ;;  %s236_s4 = scalar_lea.vmem [#allocation8], %s937_s30 }
  0x66   : > { %538 = vmatprep.subr.mxu1 %v770_v0  ;;  %540 = vmatprep.mubr.msk.f32.mxu1 %vm771_vm0, %v770_v0  ;;  %s405_s10 = sshll.u32 %s236_s4, 4  ;;  %vm389_vm3 = vcmask 261120   ;;  %s960_s25 = scalar_lea.hbm %s1006_s3, %s523_s18  ;;  %s962_s10 = int_to_ptr.vmem [resolvable:$true] %s405_s10 }
  0x67   : > { %532 = vmatpush3.msra.mxu0 %v239_v1  ;;  %s392_s26 = scalar_lea.sflag [#allocation4], %s934_s29  ;;  %s691_s9 = scalar_lea.vmem %s962_s10, 128 }
  0x68   : > { %533 = vmatprep.subr.mxu0 %v770_v0  ;;  %p692_p3 = scmp.ne.s32.totalorder %s962_s10, %s691_s9  ;;  %p1022_p12 = scmp.ne.s32.totalorder %s1016_s6, 0 }
  0x69   : > { %534 = vmatpush3.msra.mxu0 %v238_v2  ;;  %s772_s16 = smov [#allocation8]  }
  0x6a   : > { %536 = vmatmul.mubr.msk.f32.vlgmr.msra.gmra.mxu0 %vm240_vm1, %v237_v3  ;;  %p693_p10 = pnand %p692_p3, %p1022_p12  ;;  %s695_s17 = sshll.u32 %s772_s16, 4  ;;  %s696_s17 = int_to_ptr.vmem [resolvable:$false] %s695_s17 }
  0x6b   : > { %s697_s22 = scalar_lea.vmem %s696_s17, 256  ;;  %p698_p13 = scmp.lt.s32.totalorder %s962_s10, %s696_s17 }
  0x6c   : > { %p694_p2 = pneg %p693_p10  ;;  %p699_p0 = scmp.lt.s32.totalorder %s697_s22, %s691_s9 }
  0x6e   : > { %p700_p5 = por %p699_p0, %p698_p13 }
  0x70   : > { %p701_p9 = pnand %p700_p5, %p694_p2 }
 0x12a   : > { %v310_v5 = vpop.f32.mrf.mxu0 }
 0x12b   : > { %539 = vmatpush3.msra.mxu1 %v310_v5 }
 0x12c   : > { %v537_v6 = vpop.f32.mrf.mxu0  ;;  %541 = vmatmul.mubr.msk.f32.vlgmr.msra.gmra.mxu1 %vm315_vm2, %v314_v4 }
 0x1ec   : > { %v385_v7 = vpop.f32.mrf.mxu1 }
 0x1ed   : > { %390 = vst.msk [vmem:[%s236_s4] sm:$0xff] %vm389_vm3, %v385_v7 }
 0x1ee   : > { %v542_v8 = vpop.f32.mrf.mxu1 }
 0x1ef   : > { %704 = shalt.err (!%p701_p9)
}
 0x1f0   : > { %s705_s28 = scalar_lea.hbm %s960_s25, 128  ;;  %s709_s11 = scalar_lea.hbm %s1006_s3, 256 }
 0x1f1   : > { %p706_p1 = scmp.ne.s32.totalorder %s960_s25, %s705_s28  ;;  %p710_p7 = scmp.lt.s32.totalorder %s960_s25, %s1006_s3 }
 0x1f2   : > { %p711_p11 = scmp.lt.s32.totalorder %s709_s11, %s705_s28 }
 0x1f3   : > { %p707_p4 = pnand %p706_p1, %p1022_p12 }
 0x1f4   : > { %p712_p8 = por %p711_p11, %p710_p7 }
 0x1f5   : > { %p708_p6 = pneg %p707_p4 }
 0x1f7   : > { %p713_p3 = pnand %p712_p8, %p708_p6 }
 0x1f9   : > { %716 = shalt.err (!%p713_p3)
}
 0x1fa   : > { %551 = dma.vmem_to_hbm [thread:$0]  (%p1022_p12), %s962_s10, 128, %s960_s25, %s392_s26  }
 0x1fb PF: > { %s417_s23 = sand.u32 1, %s751_s12   ;;  %p1023_p10 = scmp.ne.s32.totalorder %s1012_s19, 0 }
 0x1fc   : > { %p1024_p2 = scmp.ge.s32.totalorder %s763_s15, 2  ;;  %s418_s27 = scalar_lea.sflag [#allocation4], %s417_s23 }
 0x1fe   : > { %p565_p13 = pnand %p1024_p2, %p1023_p10 }
 0x200   : > { %p566_p0 = pneg %p565_p13 }
 0x202   : > { %746 = dma.done.wait (%p566_p0), %s418_s27, 128  }
 0x203   : > { %748 = vsyncadd (%p566_p0), %s418_s27, 4294967168  ;;  %p19_p5 = scmp.ge.s32.totalorder %s847_s24, 4   ;;  %s1025_s12 = smov %s755_s13 }
 0x204   : > { %s1026_s13 = smov %s759_s14  ;;  %s1027_s14 = smov %s864_s5 }
 0x205   : > { %s1028_s15 = smov %s847_s24  ;;  %21 = sbr.rel (!%p19_p5) target bundleno = 7 (0x7), region = 94 }
 0x20a   :  { %423 = vsyncpa [#allocation3], 1 }
 0x20b   :  { %425 = vsyncpa [#allocation3 + $0x1], 1 }
 0x20c   :  { %426 = vsyncpa [#allocation6], 1 }
 0x20d   :  { %428 = vsyncpa [#allocation6 + $0x1], 1 }
 0x20e   :  { %429 = vsyncpa [#allocation4], 1 }
 0x20f   :  { %431 = vsyncpa [#allocation4 + $0x1], 1 }

// kernel: tpu_custom_call.1
= control target key start
LH: loop header
LB: loop body
LE: loop exit
PB: predicated region body
PF: predicated region fallthrough
CT: control target
= control target key end

     0   :  { %s1265_s0 = inlined_call_operand.hbm [shape: f32[2,8,8], index: 0, kind: input, shape index: {}]   ;;  %s1266_s1 = inlined_call_operand.hbm [shape: f32[2,128,128], index: 1, kind: input, shape index: {}]   ;;  %s1267_s2 = inlined_call_operand.hbm [shape: f32[128,128], index: 2, kind: input, shape index: {}]   ;;  %s1268_s3 = inlined_call_operand.hbm [shape: f32[2,8,128], index: 3, kind: output, shape index: {}]  }
   0x1   :  { %1272 = sst [smem:[#allocation15_spill]] %s1265_s0 }
   0x2   :  { %1273 = sst [smem:[#allocation16_spill]] %s1267_s2 }
   0x3   :  { %8 = vsyncpa [#allocation4], 0 }
   0x4   :  { %10 = vsyncpa [#allocation4 + $0x1], 0 }
   0x5   :  { %11 = vsyncpa [#allocation7], 0 }
   0x6   :  { %13 = vsyncpa [#allocation7 + $0x1], 0 }
   0x7   :  { %14 = vsyncpa [#allocation5], 0 }
   0x8   :  { %16 = vsyncpa [#allocation5 + $0x1], 0  ;;  %s1006_s12 = smov 0   ;;  %s1008_s13 = smov 0  }
   0x9   :  { %s1010_s14 = smov 0   ;;  %s1012_s15 = smov 0  }
   0xa   :  { %s1014_s16 = smov 0   ;;  %s1016_s17 = smov 0  }
   0xb LB: > { %s1037_s18 = sadd.s32 4294967295, %s976_s17   ;;  %s600_s19 = sadd.s32 4294967294, %s976_s17   ;;  %s976_s17 = sphi %s1016_s17, %s22_s17   ;;  %s972_s16 = sphi %s1014_s16, %s1293_s16   ;;  %s968_s15 = sphi %s1012_s15, %s1292_s15   ;;  %s964_s14 = sphi %s1010_s14, %s1291_s14   ;;  %s960_s13 = sphi %s1008_s13, %s1290_s13   ;;  %s956_s12 = sphi %s1006_s12, %s1289_s12  }
   0xc   : > { %p65_p0 = scmp.ne.s32.totalorder %s960_s13, %s956_s12  ;;  %p66_p1 = scmp.eq.s32.totalorder %s1037_s18, 0 }
   0xd   : > { %p146_p3 = scmp.eq.s32.totalorder %s600_s19, 1  ;;  %p601_p5 = scmp.ge.s32.totalorder %s976_s17, 1 }
   0xe   : > { %p1046_p4 = por %p66_p1, %p65_p0  ;;  %p153_p7 = scmp.lt.s32.totalorder %s976_s17, 3 }
   0xf   : > { %p1051_p6 = por %p146_p3, %p65_p0  ;;  %s978_s23 = smov [#allocation8]  }
  0x10   : > { %p1056_p8 = pnand %p601_p5, %p153_p7  ;;  %s165_s24 = sshll.u32 %s978_s23, 4  ;;  %s166_s24 = int_to_ptr.vmem [resolvable:$true] %s165_s24 }
  0x11   : > { %s1275_s21 = scalar_select %p1051_p6, 1, 0 }
  0x12   : > { %p734_p9 = pneg %p1056_p8  ;;  %p603_p10 = scmp.ge.s32.totalorder %s976_s17, 2 }
  0x13   : > { %s41_s26 = sadd.s32 1, %s972_s16  ;;  %s817_s27 = scalar_lea.vmem %s166_s24, 2048 }
  0x14   : > { %p1065_p11 = pnand %p734_p9, %p66_p1  ;;  %p818_p13 = scmp.ne.s32.totalorder %s166_s24, %s817_s27 }
  0x15   : > { %p825_p5 = scmp.lt.s32.totalorder %s166_s24, %s166_s24  ;;  %p826_p7 = scmp.lt.s32.totalorder %s817_s27, %s817_s27 }
  0x16   : > { %p808_p12 = pneg %p1065_p11 }
  0x17   : > { %p827_p2 = por %p826_p7, %p825_p5 }
  0x18   : > { %p820_p0 = pnand %p818_p13, %p808_p12 }
  0x1a   : > { %p821_p3 = pneg %p820_p0 }
  0x1c   : > { %p828_p6 = pnand %p827_p2, %p821_p3 }
  0x1e   : > { %831 = shalt.err (!%p828_p6)
}
  0x1f   : > { %s1269_s28 = smov 128   ;;  %s1270_s29 = smov 8  }
  0x20   : > { %s1278_s2 = sld [smem:[#allocation16_spill]]  ;;  %p43_p2 = scmp.ge.s32.totalorder %s41_s26, 2 }
  0x21   : > { %s52_s5 = sadd.s32 1, %s964_s14  ;;  %p59_p6 = scmp.ne.s32.totalorder %s964_s14, %s960_s13 }
  0x22   : > { %p60_p9 = scmp.eq.s32.totalorder %s976_s17, 0  ;;  %s1295_s26 = smov (%p43_p2, %s41_s26), 0 }
  0x23   : > { %1279 = sst [smem:[#allocation14_spill]] %s1295_s26  ;;  %p1281_p13 = scmp.eq.s32.totalorder %s1037_s18, 1 }
  0x24   : > { %p1086_p12 = por %p60_p9, %p59_p6  ;;  %s45_s8 = ssub.s32 %s972_s16, %s1295_s26 }
  0x25   : > { %p1092_p0 = por %p1281_p13, %p59_p6  ;;  %p50_p3 = scmp.eq.s32.totalorder %s45_s8, 0 }
  0x26   : > { %737 = dma.hbm_to_vmem [thread:$0]  (!%p1065_p11), %s1278_s2, 2048, %s166_s24, [#allocation7], %s1269_s28, %s1269_s28, %s1270_s29  }
  0x27   : > { %p750_p11 = scmp.lt.s32.totalorder %s976_s17, 2  ;;  %s179_s9 = sand.u32 1, %s964_s14  }
  0x28   : > { %s604_s10 = sshll.u32 %s179_s9, 3  ;;  %s605_s19 = sshll.u32 %s972_s16, 7 }
  0x29   : > { %s1101_s11 = scalar_select %p50_p3, %s964_s14, %s52_s5  }
  0x2a   : > { %s1283_s0 = sld [smem:[#allocation15_spill]]  ;;  %s183_s27 = scalar_lea.vmem [#allocation3], %s604_s10 }
  0x2b   : > { %s192_s30 = sshll.u32 %s183_s27, 4  ;;  %p1109_p5 = pnand %p750_p11, %p1086_p12  ;;  %s193_s30 = int_to_ptr.vmem [resolvable:$true] %s192_s30 }
  0x2c   : > { %s606_s8 = sshll.u32 %s179_s9, 7  ;;  %s619_s28 = sshll.u32 %s972_s16, 11 }
  0x2d   : > { %s180_s29 = scalar_lea.sflag [#allocation4], %s179_s9  ;;  %p834_p7 = pneg %p1109_p5 }
  0x2e   : > { %s845_s5 = scalar_lea.vmem %s193_s30, 128  ;;  %s981_s10 = smov [#allocation3]  }
  0x2f   : > { %p846_p2 = scmp.ne.s32.totalorder %s193_s30, %s845_s5 }
  0x30   : > { %s190_s25 = scalar_lea.hbm %s1283_s0, %s605_s19  ;;  %s850_s19 = sshll.u32 %s981_s10, 4  ;;  %s851_s19 = int_to_ptr.vmem [resolvable:$false] %s850_s19 }
  0x31   : > { %p848_p6 = pnand %p846_p2, %p834_p7  ;;  %s852_s6 = scalar_lea.vmem %s851_s19, 256 }
  0x32   : > { %p853_p12 = scmp.lt.s32.totalorder %s193_s30, %s851_s19  ;;  %p854_p13 = scmp.lt.s32.totalorder %s852_s6, %s845_s5 }
  0x33   : > { %p849_p9 = pneg %p848_p6 }
  0x34   : > { %p855_p11 = por %p854_p13, %p853_p12 }
  0x36   : > { %p856_p3 = pnand %p855_p11, %p849_p9 }
  0x38   : > { %859 = shalt.err (!%p856_p3)
}
  0x39   : > { %741 = dma.hbm_to_vmem [thread:$0]  (!%p1109_p5), %s190_s25, 128, %s193_s30, %s180_s29  }
  0x3a   : > { %s203_s9 = scalar_lea.vmem [#allocation6], %s606_s8  ;;  %s199_s24 = sand.u32 1, %s976_s17  }
  0x3b   : > { %s212_s23 = sshll.u32 %s203_s9, 4  ;;  %s211_s10 = scalar_lea.hbm %s1266_s1, %s619_s28  ;;  %s213_s23 = int_to_ptr.vmem [resolvable:$true] %s212_s23 }
  0x3c   : > { %s200_s2 = scalar_lea.sflag [#allocation7], %s199_s24  ;;  %s873_s26 = scalar_lea.vmem %s213_s23, 2048 }
  0x3d   : > { %p874_p2 = scmp.ne.s32.totalorder %s213_s23, %s873_s26  ;;  %s982_s5 = smov [#allocation6]  }
  0x3e   : > { %s878_s19 = sshll.u32 %s982_s5, 4  ;;  %s879_s19 = int_to_ptr.vmem [resolvable:$false] %s878_s19 }
  0x3f   : > { %p876_p6 = pnand %p874_p2, %p834_p7  ;;  %s880_s6 = scalar_lea.vmem %s879_s19, 4096 }
  0x40   : > { %p881_p12 = scmp.lt.s32.totalorder %s213_s23, %s879_s19  ;;  %p882_p13 = scmp.lt.s32.totalorder %s880_s6, %s873_s26 }
  0x41   : > { %p877_p9 = pneg %p876_p6 }
  0x42   : > { %p883_p11 = por %p882_p13, %p881_p12 }
  0x44   : > { %p884_p3 = pnand %p883_p11, %p877_p9 }
  0x46   : > { %887 = shalt.err (!%p884_p3)
}
  0x47   : > { %s1285_s0 = smov 8   ;;  %s1286_s28 = smov 128  }
  0x48   : > { %744 = dma.hbm_to_vmem [thread:$0]  (!%p1109_p5), %s211_s10, 2048, %s213_s23, %s200_s2, %s1286_s28, %s1286_s28, %s1285_s0  }
  0x49   : > { %224 = sbr.rel (%p1056_p8) target bundleno = 518 (0x206), region = 32  ;;  %s1136_s29 = sand.u32 (!%p1056_p8), 1, %s960_s13  }
  0x4a   : > { %s610_s26 = sshll.u32 (!%p1056_p8), %s1136_s29, 3  ;;  %s227_s25 = scalar_lea.sflag (!%p1056_p8), [#allocation4], %s1136_s29 }
  0x4b   : > { %s1142_s30 = scalar_lea.vmem (!%p1056_p8), [#allocation3], %s610_s26 }
  0x4e   : > { %939 = dma.done.wait (%p1046_p4), %s227_s25, 128  }
  0x4f   : > { %941 = vsyncadd (%p1046_p4), %s227_s25, 4294967168  ;;  %s235_s2 = sand.u32 1, %s1037_s18   ;;  %s611_s22 = sshll.u32 %s1136_s29, 7 }
  0x50   : > { %s236_s4 = scalar_lea.sflag [#allocation7], %s235_s2  ;;  %s1150_s8 = scalar_lea.vmem [#allocation6], %s611_s22 }
  0x51   : > { %943 = dma.done.wait (%p1046_p4), %s236_s4, 2048  }
  0x52   : > { %945 = vsyncadd (%p1046_p4), %s236_s4, 4294965248 }
  0x53   : > { %947 = dma.done.wait (%p66_p1), [#allocation7], 2048  }
  0x54   : > { %949 = vsyncadd (%p66_p1), [#allocation7], 4294965248  ;;  %v983_v0 = vmov 0.0   ;;  %vm984_vm0 = vmmov 0   ;;  %v301_v1 = vld [vmem:[%s1150_s8 + $0x78] sm:$0xff]  ;;  %v300_v2 = vld [vmem:[%s1150_s8 + $0x70] sm:$0xff]  ;;  %v279_v22 = vlaneseq }
  0x55   : > { %654 = vmatprep.subr.mxu0 %v983_v0  ;;  %686 = vmatprep.mubr.msk.f32.mxu0 %vm984_vm0, %v983_v0  ;;  %v299_v3 = vld [vmem:[%s1150_s8 + $0x68] sm:$0xff]  ;;  %v298_v4 = vld [vmem:[%s1150_s8 + $0x60] sm:$0xff]  ;;  %v393_v5 = vld [vmem:[#allocation8 + $0x78] sm:$0xff]  ;;  %s270_s18 = scalar_lea.vmem [#allocation9], %s610_s26  ;;  %s616_s9 = sshll.u32 %s968_s15, 7 }
  0x56   : > { %689 = vmatprep.subr.mxu1 %v983_v0  ;;  %721 = vmatprep.mubr.msk.f32.mxu1 %vm984_vm0, %v983_v0  ;;  %v297_v6 = vld [vmem:[%s1150_s8 + $0x58] sm:$0xff]  ;;  %v392_v7 = vld [vmem:[#allocation8 + $0x70] sm:$0xff]  ;;  %v391_v8 = vld [vmem:[#allocation8 + $0x68] sm:$0xff]  ;;  %v280_v27 = vand.u32 127, %v279_v22  ;;  %s480_s20 = sshll.u32 %s270_s18, 4  ;;  %s1219_s27 = scalar_lea.hbm %s1268_s3, %s616_s9  ;;  %s1214_s20 = int_to_ptr.vmem [resolvable:$true] %s480_s20 }
  0x57   : > { %655 = vmatpush3.msra.mxu0 %v301_v1  ;;  %690 = vmatpush3.msra.mxu1 %v393_v5  ;;  %v296_v9 = vld [vmem:[%s1150_s8 + $0x50] sm:$0xff]  ;;  %v390_v10 = vld [vmem:[#allocation8 + $0x60] sm:$0xff]  ;;  %v295_v11 = vld [vmem:[%s1150_s8 + $0x48] sm:$0xff]  ;;  %s466_s10 = scalar_lea.sflag [#allocation5], %s1136_s29  ;;  %s888_s5 = scalar_lea.vmem %s1214_s20, 128 }
  0x58   : > { %656 = vmatprep.subr.mxu0 %v983_v0  ;;  %691 = vmatprep.subr.mxu1 %v983_v0  ;;  %v389_v12 = vld [vmem:[#allocation8 + $0x58] sm:$0xff]  ;;  %v294_v13 = vld [vmem:[%s1150_s8 + $0x40] sm:$0xff]  ;;  %v388_v14 = vld [vmem:[#allocation8 + $0x50] sm:$0xff]  ;;  %vm283_vm1 = vcmp.lt.s32.totalorder %v280_v27, 8  ;;  %p889_p1 = scmp.ne.s32.totalorder %s1214_s20, %s888_s5  ;;  %s985_s15 = smov [#allocation9]  }
  0x59   : > { %657 = vmatpush3.msra.mxu0 %v300_v2  ;;  %692 = vmatpush3.msra.mxu1 %v392_v7  ;;  %v293_v15 = vld [vmem:[%s1150_s8 + $0x38] sm:$0xff]  ;;  %v387_v16 = vld [vmem:[#allocation8 + $0x48] sm:$0xff]  ;;  %v292_v17 = vld [vmem:[%s1150_s8 + $0x30] sm:$0xff]  ;;  %s892_s19 = sshll.u32 %s985_s15, 4  ;;  %s893_s19 = int_to_ptr.vmem [resolvable:$false] %s892_s19 }
  0x5a   : > { %658 = vmatprep.subr.mxu0 %v983_v0  ;;  %693 = vmatprep.subr.mxu1 %v983_v0  ;;  %v386_v18 = vld [vmem:[#allocation8 + $0x40] sm:$0xff]  ;;  %v291_v19 = vld [vmem:[%s1150_s8 + $0x28] sm:$0xff]  ;;  %v385_v20 = vld [vmem:[#allocation8 + $0x38] sm:$0xff]  ;;  %p890_p4 = pnand %p889_p1, %p1092_p0  ;;  %s894_s6 = scalar_lea.vmem %s893_s19, 256 }
  0x5b   : > { %659 = vmatpush3.msra.mxu0 %v299_v3  ;;  %694 = vmatpush3.msra.mxu1 %v391_v8  ;;  %v290_v21 = vld [vmem:[%s1150_s8 + $0x20] sm:$0xff]  ;;  %v384_v23 = vld [vmem:[#allocation8 + $0x30] sm:$0xff]  ;;  %v289_v24 = vld [vmem:[%s1150_s8 + $0x18] sm:$0xff]  ;;  %p895_p5 = scmp.lt.s32.totalorder %s1214_s20, %s893_s19  ;;  %p896_p7 = scmp.lt.s32.totalorder %s894_s6, %s888_s5 }
  0x5c   : > { %660 = vmatprep.subr.mxu0 %v983_v0  ;;  %695 = vmatprep.subr.mxu1 %v983_v0  ;;  %v383_v25 = vld [vmem:[#allocation8 + $0x28] sm:$0xff]  ;;  %v288_v26 = vld [vmem:[%s1150_s8 + $0x10] sm:$0xff]  ;;  %v382_v28 = vld [vmem:[#allocation8 + $0x20] sm:$0xff]  ;;  %p891_p8 = pneg %p890_p4 }
  0x5d   : > { %661 = vmatpush3.msra.mxu0 %v298_v4  ;;  %696 = vmatpush3.msra.mxu1 %v390_v10  ;;  %v287_v29 = vld [vmem:[%s1150_s8 + $0x8] sm:$0xff]  ;;  %v381_v30 = vld [vmem:[#allocation8 + $0x18] sm:$0xff]  ;;  %v286_v31 = vld [vmem:[%s1150_s8] sm:$0xff]  ;;  %p897_p2 = por %p896_p7, %p895_p5 }
  0x5e   : > { %662 = vmatprep.subr.mxu0 %v983_v0  ;;  %697 = vmatprep.subr.mxu1 %v983_v0  ;;  %v277_v32 = vld [vmem:[%s1142_s30] sm:$0xff]  ;;  %v379_v34 = vld [vmem:[#allocation8 + $0x8] sm:$0xff]  ;;  %v378_v35 = vld [vmem:[#allocation8] sm:$0xff] }
  0x5f   : > { %663 = vmatpush3.msra.mxu0 %v297_v6  ;;  %698 = vmatpush3.msra.mxu1 %v389_v12  ;;  %v380_v33 = vld [vmem:[#allocation8 + $0x10] sm:$0xff]  ;;  %p898_p6 = pnand %p897_p2, %p891_p8 }
  0x60   : > { %664 = vmatprep.subr.mxu0 %v983_v0  ;;  %699 = vmatprep.subr.mxu1 %v983_v0 }
  0x61   : > { %665 = vmatpush3.msra.mxu0 %v296_v9  ;;  %700 = vmatpush3.msra.mxu1 %v388_v14 }
  0x62   : > { %666 = vmatprep.subr.mxu0 %v983_v0  ;;  %701 = vmatprep.subr.mxu1 %v983_v0 }
  0x63   : > { %667 = vmatpush3.msra.mxu0 %v295_v11  ;;  %702 = vmatpush3.msra.mxu1 %v387_v16 }
  0x64   : > { %668 = vmatprep.subr.mxu0 %v983_v0  ;;  %703 = vmatprep.subr.mxu1 %v983_v0 }
  0x65   : > { %669 = vmatpush3.msra.mxu0 %v294_v13  ;;  %704 = vmatpush3.msra.mxu1 %v386_v18 }
  0x66   : > { %670 = vmatprep.subr.mxu0 %v983_v0  ;;  %705 = vmatprep.subr.mxu1 %v983_v0 }
  0x67   : > { %671 = vmatpush3.msra.mxu0 %v293_v15  ;;  %706 = vmatpush3.msra.mxu1 %v385_v20 }
  0x68   : > { %672 = vmatprep.subr.mxu0 %v983_v0  ;;  %707 = vmatprep.subr.mxu1 %v983_v0 }
  0x69   : > { %673 = vmatpush3.msra.mxu0 %v292_v17  ;;  %708 = vmatpush3.msra.mxu1 %v384_v23 }
  0x6a   : > { %674 = vmatprep.subr.mxu0 %v983_v0  ;;  %709 = vmatprep.subr.mxu1 %v983_v0 }
  0x6b   : > { %675 = vmatpush3.msra.mxu0 %v291_v19  ;;  %710 = vmatpush3.msra.mxu1 %v383_v25 }
  0x6c   : > { %676 = vmatprep.subr.mxu0 %v983_v0  ;;  %711 = vmatprep.subr.mxu1 %v983_v0 }
  0x6d   : > { %677 = vmatpush3.msra.mxu0 %v290_v21  ;;  %712 = vmatpush3.msra.mxu1 %v382_v28 }
  0x6e   : > { %678 = vmatprep.subr.mxu0 %v983_v0  ;;  %713 = vmatprep.subr.mxu1 %v983_v0 }
  0x6f   : > { %679 = vmatpush3.msra.mxu0 %v289_v24  ;;  %714 = vmatpush3.msra.mxu1 %v381_v30 }
  0x70   : > { %680 = vmatprep.subr.mxu0 %v983_v0  ;;  %715 = vmatprep.subr.mxu1 %v983_v0 }
  0x71   : > { %681 = vmatpush3.msra.mxu0 %v288_v26  ;;  %716 = vmatpush3.msra.mxu1 %v380_v33 }
  0x72   : > { %682 = vmatprep.subr.mxu0 %v983_v0  ;;  %717 = vmatprep.subr.mxu1 %v983_v0 }
  0x73   : > { %683 = vmatpush3.msra.mxu0 %v287_v29  ;;  %718 = vmatpush3.msra.mxu1 %v379_v34 }
  0x74   : > { %684 = vmatprep.subr.mxu0 %v983_v0  ;;  %719 = vmatprep.subr.mxu1 %v983_v0 }
  0x75   : > { %685 = vmatpush3.msra.mxu0 %v286_v31  ;;  %720 = vmatpush3.msra.mxu1 %v378_v35 }
  0x76   : > { %687 = vmatmul.mubr.msk.f32.vlgmr.msra.gmra.mxu0 %vm283_vm1, %v277_v32 }
 0x136   : > { %v368_v36 = vpop.f32.mrf.mxu0 }
 0x137   : > { %722 = vmatmul.mubr.f32.vlgmr.msra.gmra.mxu1 %v368_v36 }
 0x138   : > { %v688_v37 = vpop.f32.mrf.mxu0 }
 0x1f7   : > { %v460_v38 = vpop.f32.mrf.mxu1 }
 0x1f8   : > { %464 = vst [vmem:[%s270_s18] sm:$0xff] %v460_v38 }
 0x1f9   : > { %v723_v39 = vpop.f32.mrf.mxu1 }
 0x1fa   : > { %901 = shalt.err (!%p898_p6)
}
 0x1fb   : > { %s902_s0 = scalar_lea.hbm %s1219_s27, 128  ;;  %s906_s26 = scalar_lea.hbm %s1268_s3, 256 }
 0x1fc   : > { %p903_p9 = scmp.ne.s32.totalorder %s1219_s27, %s902_s0  ;;  %p907_p11 = scmp.lt.s32.totalorder %s1219_s27, %s1268_s3 }
 0x1fd   : > { %p908_p3 = scmp.lt.s32.totalorder %s906_s26, %s902_s0 }
 0x1fe   : > { %p904_p12 = pnand %p903_p9, %p1092_p0 }
 0x1ff   : > { %p909_p1 = por %p908_p3, %p907_p11 }
 0x200   : > { %p905_p13 = pneg %p904_p12 }
 0x202   : > { %p910_p4 = pnand %p909_p1, %p905_p13 }
 0x204   : > { %913 = shalt.err (!%p910_p4)
}
 0x205   : > { %732 = dma.vmem_to_hbm [thread:$0]  (%p1092_p0), %s1214_s20, 128, %s1219_s27, %s466_s10  }
 0x206 PF: > { %s492_s2 = sand.u32 1, %s956_s12   ;;  %p1287_p8 = scmp.ne.s32.totalorder %s1275_s21, 0 }
 0x207   : > { %s493_s22 = scalar_lea.sflag [#allocation5], %s492_s2 }
 0x208   : > { %p746_p5 = pnand %p603_p10, %p1287_p8 }
 0x20a   : > { %p747_p7 = pneg %p746_p5 }
 0x20c   : > { %951 = dma.done.wait (%p747_p7), %s493_s22, 128  }
 0x20d   : > { %953 = vsyncadd (%p747_p7), %s493_s22, 4294967168  ;;  %s22_s17 = sadd.s32 1, %s976_s17   ;;  %s1288_s7 = sld [smem:[#allocation14_spill]] }
 0x20e   : > { %p19_p2 = scmp.ge.s32.totalorder %s22_s17, 4   ;;  %s1289_s12 = smov %s960_s13 }
 0x20f   : > { %s1290_s13 = smov %s964_s14  ;;  %s1291_s14 = smov %s1101_s11 }
 0x210   : > { %s1292_s15 = smov %s972_s16  ;;  %21 = sbr.rel (!%p19_p2) target bundleno = 11 (0xb), region = 102 }
 0x213   : > { %s1293_s16 = smov %s1288_s7 }
 0x215   :  { %498 = vsyncpa [#allocation4], 1 }
 0x216   :  { %500 = vsyncpa [#allocation4 + $0x1], 1 }
 0x217   :  { %501 = vsyncpa [#allocation7], 1 }
 0x218   :  { %503 = vsyncpa [#allocation7 + $0x1], 1 }
 0x219   :  { %504 = vsyncpa [#allocation5], 1 }
 0x21a   :  { %506 = vsyncpa [#allocation5 + $0x1], 1 }

</bundles_post_ra>
